<compile_context>
chip_gen: v6e
topology: v6e:2x2x1
jax: 0.10.0
libtpu: 0.0.40
codegen_flags: <defaults>
</compile_context>

<pallas_src>
import functools

import numpy as np
import jax
import jax.numpy as jnp
from jax.experimental import pallas as pl
from jax.experimental.pallas import tpu as pltpu


def _round_up(v, m):
    return ((v + m - 1) // m) * m


# ------------------------------ Pallas kernel ------------------------------

def _conv_bn_kernel(x_ref, w_ref, shift_ref, out_ref, *, flat_starts, m, activate):
    """Fused conv (K row-tap matmuls) + folded BatchNorm shift + optional ReLU.

    x_ref     : (rows_in * Wo_al, K*Cin)  row-tile of packed input (halo included),
                                          flattened (row, col) on the sublane axis
    w_ref     : (K, K*Cin, Cout)          row-tap weights, BN scale pre-folded
    shift_ref : (1, Cout)                 BN shift (beta - mean*scale [+ bias*scale])
    out_ref   : (m, Cout)                 flat output tile, m = TILE_R * Wo_al
    """
    cout = out_ref.shape[-1]
    acc = jnp.zeros((m, cout), jnp.float32)
    for i, start in enumerate(flat_starts):
        # start and m are static multiples of Wo_al (a multiple of 8) -> aligned slice.
        win = x_ref[pl.ds(start, m), :]                         # (m, K*Cin)
        acc = acc + jnp.dot(win, w_ref[i], preferred_element_type=jnp.float32)
    acc = acc + shift_ref[...]                                  # BN shift (scale is in weights)
    if activate:
        acc = jnp.maximum(acc, 0.0)
    out_ref[...] = acc.astype(out_ref.dtype)                    # flat store, no reshape/slice


# ------------------------------ wrapper ------------------------------

def basic_block_forward(x, params, *, kernel_size, stride=1, padding=0, dilation=1,
                        bias=False, activate=False, eps=1e-5,
                        compute_dtype=jnp.float32, tile_rows=None,
                        vmem_budget_bytes=12 * 1024 * 1024):
    """NCHW in / NCHW out, matching PyTorch BasicBlock.forward (BatchNorm in eval mode)."""
    B, Cin, H, W = x.shape
    K, s, p, d = int(kernel_size), int(stride), int(padding), int(dilation)
    w = params['conv_w']                                        # (Cout, Cin, K, K)
    Cout = w.shape[0]
    out_dtype = x.dtype

    Hp, Wp = H + 2 * p, W + 2 * p
    Ho = (Hp - d * (K - 1) - 1) // s + 1
    Wo = (Wp - d * (K - 1) - 1) // s + 1
    assert Ho >= 1 and Wo >= 1, "kernel/padding/dilation/stride leave no valid output"

    # ---- Fold BatchNorm (running stats): scale into weights, shift (+bias) into an add.
    scale = params['bn_gamma'] / jnp.sqrt(params['bn_var'] + eps)          # (Cout,)
    shift = params['bn_beta'] - params['bn_mean'] * scale
    if bias:
        shift = shift + params['conv_b'] * scale
    shift = shift.reshape(1, Cout).astype(jnp.float32)
    w_scaled = w * scale[:, None, None, None]
    KC = K * Cin
    # Row-tap major, column taps folded into the contraction dim: (K, K*Cin, Cout).
    w_taps = jnp.transpose(w_scaled, (2, 3, 1, 0)).reshape(K, KC, Cout).astype(compute_dtype)

    # ---- Channels-last, zero-pad, single wrapper-side cast (bf16 path halves DMA bytes).
    x_pad = jnp.pad(jnp.transpose(x, (0, 2, 3, 1)).astype(compute_dtype),
                    ((0, 0), (p, p), (p, p), (0, 0)))                       # (B, Hp, Wp, Cin)

    # ---- Column-tap im2col along W only + column stride: (B, Hp, Wo, K*Cin).
    cols = [x_pad[:, :, j * d: j * d + (Wo - 1) * s + 1: s, :] for j in range(K)]
    x_pack = cols[0] if K == 1 else jnp.concatenate(cols, axis=-1)

    Wo_al = _round_up(Wo, 8)        # sublane alignment for the flattened (row, col) axis

    # ---- Row-stride handling: group rows by phase (row % s) so each row tap is contiguous.
    phase_list = sorted({(i * d) % s for i in range(K)})
    P = len(phase_list)
    m_max = ((K - 1) * d) // s
    in_b = jnp.dtype(compute_dtype).itemsize
    out_b = jnp.dtype(out_dtype).itemsize

    # ---- Output-row tile size: biggest tile under the VMEM budget (double-buffered in/out + acc).
    if tile_rows is None:
        per_tr = 2 * P * Wo_al * KC * in_b + 2 * Wo_al * Cout * out_b + 4 * Wo_al * Cout
        fixed = 2 * P * m_max * Wo_al * KC * in_b + 2 * K * KC * Cout * in_b
        TR = int(max(1, min(Ho, (vmem_budget_bytes - fixed) // max(per_tr, 1))))
    else:
        TR = int(max(1, min(Ho, tile_rows)))
    n_tiles = -(-Ho // TR)
    TR = -(-Ho // n_tiles)                      # rebalance tiles
    G = TR + m_max                              # rows kept per phase group (incl. halo)
    rows_in = P * G
    Ho_pad = n_tiles * TR

    # ---- Pad rows so every gathered index is in bounds, then gather per-tile row blocks
    #      (halo rows duplicated wrapper-side -> non-overlapping BlockSpec blocks).
    Hp_need = Ho_pad * s + (K - 1) * d
    x_pack = jnp.pad(x_pack, ((0, 0), (0, Hp_need - Hp), (0, Wo_al - Wo), (0, 0)))
    row_idx = (jnp.arange(n_tiles, dtype=jnp.int32)[:, None, None] * (TR * s)
               + jnp.asarray(phase_list, jnp.int32)[None, :, None]
               + jnp.arange(G, dtype=jnp.int32)[None, None, :] * s).reshape(n_tiles, rows_in)
    x_tiles = x_pack[:, row_idx]                                # (B, n_tiles, rows_in, Wo_al, KC)
    BT = B * n_tiles
    x_tiles = x_tiles.reshape(BT, rows_in * Wo_al, KC)          # flat sublane axis, lane = K*Cin

    # Static flat start of each row-tap window inside a tile (multiples of Wo_al -> aligned).
    phase_pos = {ph: i for i, ph in enumerate(phase_list)}
    flat_starts = tuple((phase_pos[(i * d) % s] * G + (i * d) // s) * Wo_al for i in range(K))
    m = TR * Wo_al

    kern = functools.partial(_conv_bn_kernel, flat_starts=flat_starts, m=m, activate=activate)

    out_flat = pl.pallas_call(
        kern,
        grid=(BT,),
        in_specs=[
            pl.BlockSpec((None, rows_in * Wo_al, KC), lambda i: (i, 0, 0)),
            pl.BlockSpec((K, KC, Cout), lambda i: (0, 0, 0)),
            pl.BlockSpec((1, Cout), lambda i: (0, 0)),
        ],
        out_specs=pl.BlockSpec((None, m, Cout), lambda i: (i, 0, 0)),
        out_shape=jax.ShapeDtypeStruct((BT, m, Cout), out_dtype),
        compiler_params=pltpu.CompilerParams(
            dimension_semantics=("parallel",),
            vmem_limit_bytes=32 * 1024 * 1024),
    )(x_tiles, w_taps, shift)

    # Strip junk columns / padded rows in the wrapper (fuses with the final transpose).
    out = out_flat.reshape(B, Ho_pad, Wo_al, Cout)[:, :Ho, :Wo, :]
    return jnp.transpose(out, (0, 3, 1, 2))                     # back to NCHW


# ------------------------------ reference & params ------------------------------

def basic_block_reference(x, params, *, kernel_size, stride=1, padding=0, dilation=1,
                          bias=False, activate=False, eps=1e-5):
    """Pure-JAX NCHW reference mirroring the PyTorch forward (BatchNorm in eval mode)."""
    out = jax.lax.conv_general_dilated(
        x, params['conv_w'], window_strides=(stride, stride),
        padding=[(padding, padding), (padding, padding)],
        rhs_dilation=(dilation, dilation),
        dimension_numbers=('NCHW', 'OIHW', 'NCHW'),
        precision=jax.lax.Precision.HIGHEST)
    if bias:
        out = out + params['conv_b'][None, :, None, None]
    scale = params['bn_gamma'] / jnp.sqrt(params['bn_var'] + eps)
    out = ((out - params['bn_mean'][None, :, None, None]) * scale[None, :, None, None]
           + params['bn_beta'][None, :, None, None])
    if activate:
        out = jnp.maximum(out, 0.0)
    return out


def init_params(key, Cin, Cout, K):
    ks = jax.random.split(key, 6)
    return dict(
        conv_w=0.1 * jax.random.normal(ks[0], (Cout, Cin, K, K), jnp.float32),
        conv_b=0.1 * jax.random.normal(ks[1], (Cout,), jnp.float32),
        bn_gamma=1.0 + 0.1 * jax.random.normal(ks[2], (Cout,), jnp.float32),
        bn_beta=0.1 * jax.random.normal(ks[3], (Cout,), jnp.float32),
        bn_mean=0.1 * jax.random.normal(ks[4], (Cout,), jnp.float32),
        bn_var=0.5 + jnp.abs(jax.random.normal(ks[5], (Cout,), jnp.float32)),
    )


if __name__ == "__main__":
    key = jax.random.PRNGKey(0)
    B, Cin, H, W = 2, 4, 16, 16
    Cout = 8

    configs = [
        dict(kernel_size=3, stride=1, padding=1, dilation=1, bias=False, activate=True),
        dict(kernel_size=3, stride=2, padding=1, dilation=1, bias=False, activate=False),
        dict(kernel_size=1, stride=1, padding=0, dilation=1, bias=True, activate=True),
        dict(kernel_size=3, stride=1, padding=2, dilation=2, bias=False, activate=True),
    ]

    for cfg in configs:
        key, kx, kp = jax.random.split(key, 3)
        x = jax.random.normal(kx, (B, Cin, H, W), jnp.float32)
        params = init_params(kp, Cin, Cout, cfg['kernel_size'])
        ref = basic_block_reference(x, params, **cfg)

        # f32 path, single tile per batch (tight tolerance)
        out = jax.block_until_ready(
            jax.jit(functools.partial(basic_block_forward, **cfg))(x, params))
        assert out.shape == ref.shape and out.dtype == ref.dtype
        np.testing.assert_allclose(np.asarray(out), np.asarray(ref), rtol=2e-4, atol=2e-4)

        # forced multi-tile path (exercises row tiling + halo + parallel grid)
        out_t = jax.block_until_ready(
            jax.jit(functools.partial(basic_block_forward, tile_rows=3, **cfg))(x, params))
        np.testing.assert_allclose(np.asarray(out_t), np.asarray(ref), rtol=2e-4, atol=2e-4)

        # bf16 MXU path (performance option, looser tolerance)
        out_bf16 = jax.block_until_ready(
            jax.jit(functools.partial(basic_block_forward,
                                      compute_dtype=jnp.bfloat16, **cfg))(x, params))
        np.testing.assert_allclose(np.asarray(out_bf16), np.asarray(ref), rtol=5e-2, atol=1e-1)

    print("KERNEL_OK")
</pallas_src>

<mosaic_0001>
module attributes {stable_mosaic.version = 11 : i64} {
  func.func @_conv_bn_kernel(%arg0: i32, %arg1: memref<1x288x12xf32, #tpu.memory_space<vmem>>, %arg2: memref<3x12x8xf32, #tpu.memory_space<vmem>>, %arg3: memref<1x8xf32, #tpu.memory_space<vmem>>, %arg4: memref<1x256x8xf32, #tpu.memory_space<vmem>>) attributes {dimension_semantics = [#tpu.dimension_semantics<parallel>], iteration_bounds = array<i64: 2>, scalar_prefetch = 0 : i64, scratch_operands = 0 : i64, tpu.core_type = #tpu.core_type<tc>, window_params = [{transform_indices = @transform_0, window_bounds = array<i64: 1, 288, 12>}, {pipeline_mode = #tpu.pipeline_mode<synchronous>, transform_indices = @transform_1, window_bounds = array<i64: 3, 12, 8>}, {pipeline_mode = #tpu.pipeline_mode<synchronous>, transform_indices = @transform_2, window_bounds = array<i64: 1, 8>}, {transform_indices = @transform_3, window_bounds = array<i64: 1, 256, 8>}]} {
    %cst = arith.constant 0.000000e+00 : f32
    %0 = vector.broadcast %cst : f32 to vector<256x8xf32>
    %c0 = arith.constant 0 : index
    %c0_0 = arith.constant 0 : index
    %c0_1 = arith.constant 0 : index
    %1 = vector.load %arg1[%c0, %c0_0, %c0_1] : memref<1x288x12xf32, #tpu.memory_space<vmem>>, vector<1x256x12xf32>
    %2 = vector.shape_cast %1 : vector<1x256x12xf32> to vector<256x12xf32>
    %c0_2 = arith.constant 0 : index
    %c0_3 = arith.constant 0 : index
    %c0_4 = arith.constant 0 : index
    %3 = vector.load %arg2[%c0_2, %c0_3, %c0_4] : memref<3x12x8xf32, #tpu.memory_space<vmem>>, vector<1x12x8xf32>
    %4 = vector.shape_cast %3 : vector<1x12x8xf32> to vector<12x8xf32>
    %cst_5 = arith.constant dense<0.000000e+00> : vector<256x8xf32>
    %5 = tpu.matmul %2, %4, %cst_5 {dimension_numbers = #tpu.dot_dimension_numbers<[1], [0], [0], [1], [0, 0, 1, 1], [], []>} : vector<256x12xf32>, vector<12x8xf32>, vector<256x8xf32> -> vector<256x8xf32>
    %6 = arith.addf %0, %5 : vector<256x8xf32>
    %c0_6 = arith.constant 0 : index
    %c16 = arith.constant 16 : index
    %c0_7 = arith.constant 0 : index
    %7 = vector.load %arg1[%c0_6, %c16, %c0_7] : memref<1x288x12xf32, #tpu.memory_space<vmem>>, vector<1x256x12xf32>
    %8 = vector.shape_cast %7 : vector<1x256x12xf32> to vector<256x12xf32>
    %c1 = arith.constant 1 : index
    %c0_8 = arith.constant 0 : index
    %c0_9 = arith.constant 0 : index
    %9 = vector.load %arg2[%c1, %c0_8, %c0_9] : memref<3x12x8xf32, #tpu.memory_space<vmem>>, vector<1x12x8xf32>
    %10 = vector.shape_cast %9 : vector<1x12x8xf32> to vector<12x8xf32>
    %cst_10 = arith.constant dense<0.000000e+00> : vector<256x8xf32>
    %11 = tpu.matmul %8, %10, %cst_10 {dimension_numbers = #tpu.dot_dimension_numbers<[1], [0], [0], [1], [0, 0, 1, 1], [], []>} : vector<256x12xf32>, vector<12x8xf32>, vector<256x8xf32> -> vector<256x8xf32>
    %12 = arith.addf %6, %11 : vector<256x8xf32>
    %c0_11 = arith.constant 0 : index
    %c32 = arith.constant 32 : index
    %c0_12 = arith.constant 0 : index
    %13 = vector.load %arg1[%c0_11, %c32, %c0_12] : memref<1x288x12xf32, #tpu.memory_space<vmem>>, vector<1x256x12xf32>
    %14 = vector.shape_cast %13 : vector<1x256x12xf32> to vector<256x12xf32>
    %c2 = arith.constant 2 : index
    %c0_13 = arith.constant 0 : index
    %c0_14 = arith.constant 0 : index
    %15 = vector.load %arg2[%c2, %c0_13, %c0_14] : memref<3x12x8xf32, #tpu.memory_space<vmem>>, vector<1x12x8xf32>
    %16 = vector.shape_cast %15 : vector<1x12x8xf32> to vector<12x8xf32>
    %cst_15 = arith.constant dense<0.000000e+00> : vector<256x8xf32>
    %17 = tpu.matmul %14, %16, %cst_15 {dimension_numbers = #tpu.dot_dimension_numbers<[1], [0], [0], [1], [0, 0, 1, 1], [], []>} : vector<256x12xf32>, vector<12x8xf32>, vector<256x8xf32> -> vector<256x8xf32>
    %18 = arith.addf %12, %17 : vector<256x8xf32>
    %c0_16 = arith.constant 0 : index
    %c0_17 = arith.constant 0 : index
    %19 = vector.load %arg3[%c0_16, %c0_17] : memref<1x8xf32, #tpu.memory_space<vmem>>, vector<1x8xf32>
    %20 = vector.broadcast %19 : vector<1x8xf32> to vector<256x8xf32>
    %21 = arith.addf %18, %20 : vector<256x8xf32>
    %cst_18 = arith.constant 0.000000e+00 : f32
    %22 = vector.broadcast %cst_18 : f32 to vector<256x8xf32>
    %23 = arith.maximumf %21, %22 : vector<256x8xf32>
    %c0_19 = arith.constant 0 : index
    %c0_20 = arith.constant 0 : index
    %c0_21 = arith.constant 0 : index
    %24 = vector.load %arg4[%c0_19, %c0_20, %c0_21] : memref<1x256x8xf32, #tpu.memory_space<vmem>>, vector<1x256x8xf32>
    %25 = vector.shape_cast %24 : vector<1x256x8xf32> to vector<256x8xf32>
    %26 = vector.shape_cast %23 : vector<256x8xf32> to vector<1x256x8xf32>
    tpu.vector_store %arg4[%c0_19, %c0_20, %c0_21], %26 {strides = array<i32>} : memref<1x256x8xf32, #tpu.memory_space<vmem>>, vector<1x256x8xf32>,
    return
  }
  func.func @transform_0(%arg0: i32) -> (i32, i32, i32) {
    %c0_i32 = arith.constant 0 : i32
    %c0_i32_0 = arith.constant 0 : i32
    %c0_i32_1 = arith.constant 0 : i32
    return %arg0, %c0_i32, %c0_i32_0 : i32, i32, i32
  }
  func.func @transform_1(%arg0: i32) -> (i32, i32, i32) {
    %c0_i32 = arith.constant 0 : i32
    %c0_i32_0 = arith.constant 0 : i32
    %c0_i32_1 = arith.constant 0 : i32
    %c0_i32_2 = arith.constant 0 : i32
    return %c0_i32, %c0_i32_0, %c0_i32_1 : i32, i32, i32
  }
  func.func @transform_2(%arg0: i32) -> (i32, i32) {
    %c0_i32 = arith.constant 0 : i32
    %c0_i32_0 = arith.constant 0 : i32
    %c0_i32_1 = arith.constant 0 : i32
    return %c0_i32, %c0_i32_0 : i32, i32
  }
  func.func @transform_3(%arg0: i32) -> (i32, i32, i32) {
    %c0_i32 = arith.constant 0 : i32
    %c0_i32_0 = arith.constant 0 : i32
    %c0_i32_1 = arith.constant 0 : i32
    return %arg0, %c0_i32, %c0_i32_0 : i32, i32, i32
  }
}

</mosaic_0001>

<bundles_post_ra>
// kernel: basic_block_forward.1
= control target key start
LH: loop header
LB: loop body
LE: loop exit
PB: predicated region body
PF: predicated region fallthrough
CT: control target
= control target key end

     0   :  { %s1734_s12 = smov 0   ;;  %s2194_s0 = inlined_call_operand.vmem [shape: f32[2,288,12], index: 0, kind: input, shape index: {}]   ;;  %s2195_s1 = inlined_call_operand.vmem [shape: f32[3,12,8], index: 1, kind: input, shape index: {}]   ;;  %s2196_s2 = inlined_call_operand.vmem [shape: f32[1,8], index: 2, kind: input, shape index: {}]   ;;  %s2197_s3 = inlined_call_operand.vmem [shape: f32[2,256,8], index: 3, kind: output, shape index: {}]  }
   0x1 LB: > { %s1320_s13 = sadd.s32 4294967295, %s1712_s12   ;;  %p1324_p0 = scmp.ge.s32.totalorder %s1712_s12, 1  ;;  %s1712_s12 = sphi %s1734_s12, %s13_s12  }
   0x2   : > { %p137_p1 = scmp.lt.s32.totalorder %s1712_s12, 3 }
   0x4   : > { %p138_p2 = pnand %p1324_p0, %p137_p1 }
   0x5   : > { %p161_p3 = scmp.lt.s32.totalorder (!%p138_p2), %s1320_s13, 1 }
   0x6   : > { %141 = sbr.rel (%p138_p2) target bundleno = 314 (0x13a), region = 32 }
   0xb   : > { %v1329_v0 = vld [vmem:[%s2195_s1 + $0x18] sm:$0xf]  ;;  %vm307_vm0 = vcmask 1043456   ;;  %v1328_v1 = vld [vmem:[%s2195_s1 + $0x10] sm:$0xff]  ;;  %s2199_s13 = smov (!%p161_p3, %s1320_s13), 1  ;;  %vm210_vm1 = vcmask 97280  }
   0xc   : > { %1693 = vmatprep.subr.msk.mxu1 %vm307_vm0, %v1329_v0  ;;  %1537 = vmatprep.subr.msk.mxu0 %vm307_vm0, %v1329_v0  ;;  %v204_v2 = vld [vmem:[%s2195_s1 + $0x8] sm:$0xf]  ;;  %s1697_s22 = smul.u32 288, %s2199_s13  ;;  %v203_v10 = vld [vmem:[%s2195_s1] sm:$0xff]  ;;  %s1434_s5 = sshll.u32 %s2199_s13, 8  ;;  %vm1232_vm2 = vcmask 64512  }
   0xd   : > { %1695 = vmatpush3.msk.msra.mxu1 %vm307_vm0, %v1329_v0  ;;  %1538 = vmatpush3.msk.msra.mxu0 %vm307_vm0, %v1329_v0  ;;  %v1397_v3 = vld [vmem:[%s2195_s1 + $0x28] sm:$0xf]  ;;  %v1396_v11 = vld [vmem:[%s2195_s1 + $0x20] sm:$0xff]  ;;  %s2069_s8 = scalar_lea.vmem %s2197_s3, %s1434_s5 }
   0xe   : > { %1694 = vmatprep.subr.mxu1 %v1328_v1  ;;  %1539 = vmatprep.subr.mxu0 %v1328_v1  ;;  %s1766_s25 = scalar_lea.vmem %s2194_s0, %s1697_s22 }
   0xf   : > { %1696 = vmatpush3.msra.mxu1 %v1328_v1  ;;  %1540 = vmatpush3.msra.mxu0 %v1328_v1  ;;  %v1769_v4 = vld [vmem:[%s1766_s25 + $0x10] sm:$0xff]  ;;  %v1775_v6 = vld [vmem:[%s1766_s25 + $0x18] sm:$0xff]  ;;  %v1785_v8 = vld [vmem:[%s1766_s25 + $0x20] sm:$0xff] }
  0x10   : > { %1589 = vmatprep.subr.msk.mxu1 %vm307_vm0, %v204_v2  ;;  %1641 = vmatprep.subr.msk.mxu0 %vm307_vm0, %v1397_v3  ;;  %v1772_v5 = vld [vmem:[%s1766_s25 + $0x90] sm:$0xff]  ;;  %v1782_v7 = vld [vmem:[%s1766_s25 + $0x98] sm:$0xff]  ;;  %v1788_v9 = vld [vmem:[%s1766_s25 + $0xa0] sm:$0xff] }
  0x11   : > { %1541 = vmatprep.mubr.msk.f32.mxu0 %vm210_vm1, %v1769_v4  ;;  %1565 = vmatprep.mubr.msk.f32.mxu1 %vm210_vm1, %v1772_v5  ;;  %v1803_v12 = vld [vmem:[%s1766_s25 + $0x28] sm:$0xff]  ;;  %v1813_v14 = vld [vmem:[%s1766_s25 + $0x30] sm:$0xff]  ;;  %v178_v16 = vld [vmem:[%s1766_s25 + $0x38] sm:$0xff] }
  0x12   : > { %1542 = vmatmul.mubr.msk.f32.vlgmr.msra.gmra.mxu0 %vm210_vm1, %v1775_v6  ;;  %1566 = vmatmul.mubr.msk.f32.vlgmr.msra.gmra.mxu1 %vm210_vm1, %v1782_v7  ;;  %v1806_v13 = vld [vmem:[%s1766_s25 + $0xa8] sm:$0xff]  ;;  %v1816_v15 = vld [vmem:[%s1766_s25 + $0xb0] sm:$0xff]  ;;  %v1828_v17 = vld [vmem:[%s1766_s25 + $0xb8] sm:$0xff] }
  0x13   : > { %1590 = vmatpush3.msk.msra.mxu1 %vm307_vm0, %v204_v2  ;;  %1642 = vmatpush3.msk.msra.mxu0 %vm307_vm0, %v1397_v3  ;;  %v179_v18 = vld [vmem:[%s1766_s25 + $0x40] sm:$0xff]  ;;  %v180_v20 = vld [vmem:[%s1766_s25 + $0x48] sm:$0xff]  ;;  %v181_v22 = vld [vmem:[%s1766_s25 + $0x50] sm:$0xff] }
  0x14   : > { %1544 = vmatprep.mubr.msk.f32.mxu0 %vm210_vm1, %v1785_v8  ;;  %1568 = vmatprep.mubr.msk.f32.mxu1 %vm210_vm1, %v1788_v9  ;;  %v1832_v19 = vld [vmem:[%s1766_s25 + $0xc0] sm:$0xff]  ;;  %v1842_v21 = vld [vmem:[%s1766_s25 + $0xc8] sm:$0xff]  ;;  %v1846_v23 = vld [vmem:[%s1766_s25 + $0xd0] sm:$0xff] }
  0x15   : > { %1591 = vmatprep.subr.mxu1 %v203_v10  ;;  %1643 = vmatprep.subr.mxu0 %v1396_v11  ;;  %v182_v24 = vld [vmem:[%s1766_s25 + $0x58] sm:$0xff]  ;;  %v183_v26 = vld [vmem:[%s1766_s25 + $0x60] sm:$0xff]  ;;  %v184_v28 = vld [vmem:[%s1766_s25 + $0x68] sm:$0xff] }
  0x16   : > { %1545 = vmatmul.mubr.msk.f32.gmra.mxu0 %vm210_vm1, %v1803_v12  ;;  %1569 = vmatmul.mubr.msk.f32.gmra.mxu1 %vm210_vm1, %v1806_v13  ;;  %v1856_v25 = vld [vmem:[%s1766_s25 + $0xd8] sm:$0xff]  ;;  %v1860_v27 = vld [vmem:[%s1766_s25 + $0xe0] sm:$0xff]  ;;  %v1870_v29 = vld [vmem:[%s1766_s25 + $0xe8] sm:$0xff] }
  0x17   : > { %1547 = vmatprep.mubr.msk.f32.mxu0 %vm210_vm1, %v1813_v14  ;;  %1571 = vmatprep.mubr.msk.f32.mxu1 %vm210_vm1, %v1816_v15  ;;  %v185_v30 = vld [vmem:[%s1766_s25 + $0x70] sm:$0xff]  ;;  %v186_v32 = vld [vmem:[%s1766_s25 + $0x78] sm:$0xff]  ;;  %v187_v34 = vld [vmem:[%s1766_s25 + $0x80] sm:$0xff] }
  0x18   : > { %1592 = vmatpush3.msra.mxu1 %v203_v10  ;;  %1644 = vmatpush3.msra.mxu0 %v1396_v11  ;;  %v1874_v31 = vld [vmem:[%s1766_s25 + $0xf0] sm:$0xff]  ;;  %v1884_v33 = vld [vmem:[%s1766_s25 + $0xf8] sm:$0xff]  ;;  %v1888_v35 = vld [vmem:[%s1766_s25 + $0x100] sm:$0xff] }
  0x19   : > { %v188_v36 = vld [vmem:[%s1766_s25 + $0x88] sm:$0xff]  ;;  %v171_v38 = vld [vmem:[%s1766_s25] sm:$0xff]  ;;  %v800_v40 = vld [vmem:[%s1766_s25 + $0x110] sm:$0xff] }
  0x1a   : > { %1548 = vmatmul.mubr.msk.f32.gmra.mxu0 %vm210_vm1, %v178_v16  ;;  %1572 = vmatmul.mubr.msk.f32.gmra.mxu1 %vm210_vm1, %v1828_v17  ;;  %v1898_v37 = vld [vmem:[%s1766_s25 + $0x108] sm:$0xff]  ;;  %v801_v41 = vld [vmem:[%s1766_s25 + $0x118] sm:$0xff] }
  0x1b   : > { %1550 = vmatprep.mubr.msk.f32.mxu0 %vm210_vm1, %v179_v18  ;;  %1574 = vmatprep.mubr.msk.f32.mxu1 %vm210_vm1, %v1832_v19  ;;  %v172_v39 = vld [vmem:[%s1766_s25 + $0x8] sm:$0xff] }
  0x1e   : > { %1551 = vmatmul.mubr.msk.f32.gmra.mxu0 %vm210_vm1, %v180_v20  ;;  %1575 = vmatmul.mubr.msk.f32.gmra.mxu1 %vm210_vm1, %v1842_v21 }
  0x1f   : > { %1553 = vmatprep.mubr.msk.f32.mxu0 %vm210_vm1, %v181_v22  ;;  %1577 = vmatprep.mubr.msk.f32.mxu1 %vm210_vm1, %v1846_v23 }
  0x22   : > { %1554 = vmatmul.mubr.msk.f32.gmra.mxu0 %vm210_vm1, %v182_v24  ;;  %1578 = vmatmul.mubr.msk.f32.gmra.mxu1 %vm210_vm1, %v1856_v25 }
  0x23   : > { %1556 = vmatprep.mubr.msk.f32.mxu0 %vm210_vm1, %v183_v26  ;;  %1580 = vmatprep.mubr.msk.f32.mxu1 %vm210_vm1, %v1860_v27 }
  0x26   : > { %1557 = vmatmul.mubr.msk.f32.gmra.mxu0 %vm210_vm1, %v184_v28  ;;  %1581 = vmatmul.mubr.msk.f32.gmra.mxu1 %vm210_vm1, %v1870_v29 }
  0x27   : > { %1559 = vmatprep.mubr.msk.f32.mxu0 %vm210_vm1, %v185_v30  ;;  %1583 = vmatprep.mubr.msk.f32.mxu1 %vm210_vm1, %v1874_v31 }
  0x2a   : > { %1560 = vmatmul.mubr.msk.f32.gmra.mxu0 %vm210_vm1, %v186_v32  ;;  %1584 = vmatmul.mubr.msk.f32.gmra.mxu1 %vm210_vm1, %v1884_v33 }
  0x2b   : > { %1562 = vmatprep.mubr.msk.f32.mxu0 %vm210_vm1, %v187_v34  ;;  %1586 = vmatprep.mubr.msk.f32.mxu1 %vm210_vm1, %v1888_v35 }
  0x2e   : > { %1563 = vmatmul.mubr.msk.f32.gmra.mxu0 %vm210_vm1, %v188_v36  ;;  %1587 = vmatmul.mubr.msk.f32.gmra.mxu1 %vm210_vm1, %v1898_v37 }
  0x2f   : > { %1593 = vmatprep.mubr.msk.f32.mxu1 %vm210_vm1, %v171_v38  ;;  %1645 = vmatprep.mubr.msk.f32.mxu0 %vm210_vm1, %v1785_v8 }
  0x32   : > { %1594 = vmatmul.mubr.msk.f32.vlgmr.msra.gmra.mxu1 %vm210_vm1, %v172_v39  ;;  %1646 = vmatmul.mubr.msk.f32.vlgmr.msra.gmra.mxu0 %vm210_vm1, %v1803_v12 }
  0x33   : > { %1596 = vmatprep.mubr.msk.f32.mxu1 %vm210_vm1, %v1769_v4  ;;  %1648 = vmatprep.mubr.msk.f32.mxu0 %vm210_vm1, %v1813_v14 }
  0x36   : > { %1597 = vmatmul.mubr.msk.f32.gmra.mxu1 %vm210_vm1, %v1775_v6  ;;  %1649 = vmatmul.mubr.msk.f32.gmra.mxu0 %vm210_vm1, %v178_v16 }
  0x37   : > { %1599 = vmatprep.mubr.msk.f32.mxu1 %vm210_vm1, %v1785_v8  ;;  %1651 = vmatprep.mubr.msk.f32.mxu0 %vm210_vm1, %v179_v18 }
  0x3a   : > { %1600 = vmatmul.mubr.msk.f32.gmra.mxu1 %vm210_vm1, %v1803_v12  ;;  %1652 = vmatmul.mubr.msk.f32.gmra.mxu0 %vm210_vm1, %v180_v20 }
  0x3b   : > { %1602 = vmatprep.mubr.msk.f32.mxu1 %vm210_vm1, %v1813_v14  ;;  %1654 = vmatprep.mubr.msk.f32.mxu0 %vm210_vm1, %v181_v22 }
  0x3e   : > { %1603 = vmatmul.mubr.msk.f32.gmra.mxu1 %vm210_vm1, %v178_v16  ;;  %1655 = vmatmul.mubr.msk.f32.gmra.mxu0 %vm210_vm1, %v182_v24 }
  0x3f   : > { %1605 = vmatprep.mubr.msk.f32.mxu1 %vm210_vm1, %v179_v18  ;;  %1657 = vmatprep.mubr.msk.f32.mxu0 %vm210_vm1, %v183_v26 }
  0x42   : > { %1606 = vmatmul.mubr.msk.f32.gmra.mxu1 %vm210_vm1, %v180_v20  ;;  %1658 = vmatmul.mubr.msk.f32.gmra.mxu0 %vm210_vm1, %v184_v28 }
  0x43   : > { %1608 = vmatprep.mubr.msk.f32.mxu1 %vm210_vm1, %v181_v22  ;;  %1660 = vmatprep.mubr.msk.f32.mxu0 %vm210_vm1, %v185_v30 }
  0x46   : > { %1609 = vmatmul.mubr.msk.f32.gmra.mxu1 %vm210_vm1, %v182_v24  ;;  %1661 = vmatmul.mubr.msk.f32.gmra.mxu0 %vm210_vm1, %v186_v32 }
  0x47   : > { %1611 = vmatprep.mubr.msk.f32.mxu1 %vm210_vm1, %v183_v26  ;;  %1663 = vmatprep.mubr.msk.f32.mxu0 %vm210_vm1, %v187_v34 }
  0x4a   : > { %1612 = vmatmul.mubr.msk.f32.gmra.mxu1 %vm210_vm1, %v184_v28  ;;  %1664 = vmatmul.mubr.msk.f32.gmra.mxu0 %vm210_vm1, %v188_v36 }
  0x4b   : > { %1614 = vmatprep.mubr.msk.f32.mxu1 %vm210_vm1, %v185_v30  ;;  %1666 = vmatprep.mubr.msk.f32.mxu0 %vm210_vm1, %v1772_v5 }
  0x4e   : > { %1615 = vmatmul.mubr.msk.f32.gmra.mxu1 %vm210_vm1, %v186_v32  ;;  %1667 = vmatmul.mubr.msk.f32.gmra.mxu0 %vm210_vm1, %v1782_v7 }
  0x4f   : > { %1617 = vmatprep.mubr.msk.f32.mxu1 %vm210_vm1, %v187_v34  ;;  %1669 = vmatprep.mubr.msk.f32.mxu0 %vm210_vm1, %v1788_v9 }
  0x52   : > { %1618 = vmatmul.mubr.msk.f32.gmra.mxu1 %vm210_vm1, %v188_v36  ;;  %1670 = vmatmul.mubr.msk.f32.gmra.mxu0 %vm210_vm1, %v1806_v13 }
  0x53   : > { %1620 = vmatprep.mubr.msk.f32.mxu1 %vm210_vm1, %v1772_v5  ;;  %1672 = vmatprep.mubr.msk.f32.mxu0 %vm210_vm1, %v1816_v15 }
  0x56   : > { %1621 = vmatmul.mubr.msk.f32.gmra.mxu1 %vm210_vm1, %v1782_v7  ;;  %1673 = vmatmul.mubr.msk.f32.gmra.mxu0 %vm210_vm1, %v1828_v17 }
  0x57   : > { %1623 = vmatprep.mubr.msk.f32.mxu1 %vm210_vm1, %v1788_v9  ;;  %1675 = vmatprep.mubr.msk.f32.mxu0 %vm210_vm1, %v1832_v19 }
  0x5a   : > { %1624 = vmatmul.mubr.msk.f32.gmra.mxu1 %vm210_vm1, %v1806_v13  ;;  %1676 = vmatmul.mubr.msk.f32.gmra.mxu0 %vm210_vm1, %v1842_v21  ;;  %v2062_v13 = vld [vmem:[%s2196_s2] ss:$0 sm:$0xff] }
  0x5b   : > { %1626 = vmatprep.mubr.msk.f32.mxu1 %vm210_vm1, %v1816_v15  ;;  %1678 = vmatprep.mubr.msk.f32.mxu0 %vm210_vm1, %v1846_v23 }
  0x5e   : > { %1627 = vmatmul.mubr.msk.f32.gmra.mxu1 %vm210_vm1, %v1828_v17  ;;  %1679 = vmatmul.mubr.msk.f32.gmra.mxu0 %vm210_vm1, %v1856_v25 }
  0x5f   : > { %1629 = vmatprep.mubr.msk.f32.mxu1 %vm210_vm1, %v1832_v19  ;;  %1681 = vmatprep.mubr.msk.f32.mxu0 %vm210_vm1, %v1860_v27 }
  0x62   : > { %1630 = vmatmul.mubr.msk.f32.gmra.mxu1 %vm210_vm1, %v1842_v21  ;;  %1682 = vmatmul.mubr.msk.f32.gmra.mxu0 %vm210_vm1, %v1870_v29 }
  0x63   : > { %1632 = vmatprep.mubr.msk.f32.mxu1 %vm210_vm1, %v1846_v23  ;;  %1684 = vmatprep.mubr.msk.f32.mxu0 %vm210_vm1, %v1874_v31 }
  0x66   : > { %1633 = vmatmul.mubr.msk.f32.gmra.mxu1 %vm210_vm1, %v1856_v25  ;;  %1685 = vmatmul.mubr.msk.f32.gmra.mxu0 %vm210_vm1, %v1884_v33 }
  0x67   : > { %1635 = vmatprep.mubr.msk.f32.mxu1 %vm210_vm1, %v1860_v27  ;;  %1687 = vmatprep.mubr.msk.f32.mxu0 %vm210_vm1, %v1888_v35 }
  0x6a   : > { %1636 = vmatmul.mubr.msk.f32.gmra.mxu1 %vm210_vm1, %v1870_v29  ;;  %1688 = vmatmul.mubr.msk.f32.gmra.mxu0 %vm210_vm1, %v1898_v37 }
  0x6b   : > { %1638 = vmatprep.mubr.msk.f32.mxu1 %vm210_vm1, %v1874_v31  ;;  %1690 = vmatprep.mubr.msk.f32.mxu0 %vm210_vm1, %v800_v40 }
  0x6e   : > { %1639 = vmatmul.mubr.msk.f32.gmra.mxu1 %vm210_vm1, %v1884_v33  ;;  %1691 = vmatmul.mubr.msk.f32.gmra.mxu0 %vm210_vm1, %v801_v41 }
  0xd2   : > { %v1543_v42 = vpop.f32.mrf.mxu0  ;;  %v2009_v43 = vpop.f32.mrf.mxu1 }
  0xd4   : > { %v377_v44 = vpop.f32.mrf.mxu0  ;;  %v2011_v45 = vpop.f32.mrf.mxu1 }
  0xd6   : > { %v1546_v46 = vpop.f32.mrf.mxu0  ;;  %v2013_v47 = vpop.f32.mrf.mxu1 }
  0xd8   : > { %v387_v48 = vpop.f32.mrf.mxu0  ;;  %v2015_v49 = vpop.f32.mrf.mxu1 }
  0xda   : > { %v1549_v50 = vpop.f32.mrf.mxu0  ;;  %v2017_v51 = vpop.f32.mrf.mxu1 }
  0xdc   : > { %v397_v52 = vpop.f32.mrf.mxu0  ;;  %v2019_v53 = vpop.f32.mrf.mxu1 }
  0xde   : > { %v1552_v54 = vpop.f32.mrf.mxu0  ;;  %v2021_v55 = vpop.f32.mrf.mxu1 }
  0xe0   : > { %v2023_v56 = vpop.f32.mrf.mxu0  ;;  %v2025_v57 = vpop.f32.mrf.mxu1 }
  0xe2   : > { %v2027_v58 = vpop.f32.mrf.mxu0  ;;  %v2029_v59 = vpop.f32.mrf.mxu1 }
  0xe4   : > { %v2031_v60 = vpop.f32.mrf.mxu0  ;;  %v2033_v61 = vpop.f32.mrf.mxu1 }
  0xe6   : > { %v2035_v62 = vpop.f32.mrf.mxu0  ;;  %v2037_v63 = vpop.f32.mrf.mxu1 }
  0xe8   : > { %v2039_v0 = vpop.f32.mrf.mxu0  ;;  %v2041_v1 = vpop.f32.mrf.mxu1 }
  0xea   : > { %v2043_v2 = vpop.f32.mrf.mxu0  ;;  %v2045_v3 = vpop.f32.mrf.mxu1 }
  0xec   : > { %v2047_v4 = vpop.f32.mrf.mxu0  ;;  %v2049_v5 = vpop.f32.mrf.mxu1 }
  0xee   : > { %v2051_v6 = vpop.f32.mrf.mxu0  ;;  %v2053_v7 = vpop.f32.mrf.mxu1 }
  0xf0   : > { %v2055_v8 = vpop.f32.mrf.mxu0  ;;  %v2057_v9 = vpop.f32.mrf.mxu1 }
  0xf2   : > { %v1595_v10 = vpop.f32.mrf.mxu1  ;;  %v1647_v11 = vpop.f32.mrf.mxu0 }
  0xf3   : > { %v617_v12 = vadd.f32 %v1595_v10, %v1543_v42 }
  0xf4   : > { %v611_v14 = vpop.f32.mrf.mxu1  ;;  %v970_v15 = vpop.f32.mrf.mxu0 }
  0xf5   : > { %v1130_v16 = vadd.f32 %v1647_v11, %v617_v12  ;;  %v612_v17 = vadd.f32 %v611_v14, %v377_v44 }
  0xf6   : > { %v1598_v18 = vpop.f32.mrf.mxu1  ;;  %v1650_v19 = vpop.f32.mrf.mxu0 }
  0xf7   : > { %v1169_v20 = vadd.f32 %v2062_v13, %v1130_v16  ;;  %v1129_v21 = vadd.f32 %v970_v15, %v612_v17  ;;  %v627_v22 = vadd.f32 %v1598_v18, %v1546_v46 }
  0xf8   : > { %v621_v23 = vpop.f32.mrf.mxu1  ;;  %v980_v24 = vpop.f32.mrf.mxu0 }
  0xf9   : > { %v1201_v25 = vmax.f32 %v1169_v20, 0.0  ;;  %v1168_v26 = vadd.f32 %v2062_v13, %v1129_v21  ;;  %v1132_v27 = vadd.f32 %v1650_v19, %v627_v22  ;;  %v622_v28 = vadd.f32 %v621_v23, %v387_v48 }
  0xfa   : > { %v1601_v29 = vpop.f32.mrf.mxu1  ;;  %v1653_v30 = vpop.f32.mrf.mxu0 }
  0xfb   : > { %1234 = vst.msk [vmem:[%s2069_s8 + $0x8] sm:$0xff] %vm1232_vm2, %v1201_v25  ;;  %v1200_v31 = vmax.f32 %v1168_v26, 0.0  ;;  %v1171_v32 = vadd.f32 %v2062_v13, %v1132_v27  ;;  %v1131_v33 = vadd.f32 %v980_v24, %v622_v28  ;;  %v637_v34 = vadd.f32 %v1601_v29, %v1549_v50 }
  0xfc   : > { %v631_v35 = vpop.f32.mrf.mxu1  ;;  %v990_v36 = vpop.f32.mrf.mxu0 }
  0xfd   : > { %1233 = vst.msk [vmem:[%s2069_s8] sm:$0xff] %vm1232_vm2, %v1200_v31  ;;  %v1203_v37 = vmax.f32 %v1171_v32, 0.0  ;;  %v1170_v38 = vadd.f32 %v2062_v13, %v1131_v33  ;;  %v1134_v39 = vadd.f32 %v1653_v30, %v637_v34  ;;  %v632_v40 = vadd.f32 %v631_v35, %v397_v52 }
  0xfe   : > { %v1604_v41 = vpop.f32.mrf.mxu1  ;;  %v1656_v42 = vpop.f32.mrf.mxu0 }
  0xff   : > { %1236 = vst.msk [vmem:[%s2069_s8 + $0x18] sm:$0xff] %vm1232_vm2, %v1203_v37  ;;  %v1202_v44 = vmax.f32 %v1170_v38, 0.0  ;;  %v1173_v46 = vadd.f32 %v2062_v13, %v1134_v39  ;;  %v1133_v48 = vadd.f32 %v990_v36, %v632_v40  ;;  %v647_v50 = vadd.f32 %v1604_v41, %v1552_v54 }
 0x100   : > { %v641_v10 = vpop.f32.mrf.mxu1  ;;  %v1000_v11 = vpop.f32.mrf.mxu0 }
 0x101   : > { %1235 = vst.msk [vmem:[%s2069_s8 + $0x10] sm:$0xff] %vm1232_vm2, %v1202_v44  ;;  %v1205_v12 = vmax.f32 %v1173_v46, 0.0  ;;  %v1172_v14 = vadd.f32 %v2062_v13, %v1133_v48  ;;  %v1136_v15 = vadd.f32 %v1656_v42, %v647_v50  ;;  %v642_v52 = vadd.f32 %v641_v10, %v2023_v56 }
 0x102   : > { %v1607_v16 = vpop.f32.mrf.mxu1  ;;  %v1659_v17 = vpop.f32.mrf.mxu0 }
 0x103   : > { %1238 = vst.msk [vmem:[%s2069_s8 + $0x28] sm:$0xff] %vm1232_vm2, %v1205_v12  ;;  %v1204_v18 = vmax.f32 %v1172_v14, 0.0  ;;  %v1175_v19 = vadd.f32 %v2062_v13, %v1136_v15  ;;  %v1135_v54 = vadd.f32 %v1000_v11, %v642_v52  ;;  %v657_v20 = vadd.f32 %v1607_v16, %v2027_v58 }
 0x104   : > { %v651_v21 = vpop.f32.mrf.mxu1  ;;  %v1010_v22 = vpop.f32.mrf.mxu0 }
 0x105   : > { %1237 = vst.msk [vmem:[%s2069_s8 + $0x20] sm:$0xff] %vm1232_vm2, %v1204_v18  ;;  %v1207_v23 = vmax.f32 %v1175_v19, 0.0  ;;  %v1174_v24 = vadd.f32 %v2062_v13, %v1135_v54  ;;  %v1138_v56 = vadd.f32 %v1659_v17, %v657_v20  ;;  %v652_v25 = vadd.f32 %v651_v21, %v2031_v60 }
 0x106   : > { %v1610_v26 = vpop.f32.mrf.mxu1  ;;  %v1662_v27 = vpop.f32.mrf.mxu0 }
 0x107   : > { %1240 = vst.msk [vmem:[%s2069_s8 + $0x38] sm:$0xff] %vm1232_vm2, %v1207_v23  ;;  %v1206_v28 = vmax.f32 %v1174_v24, 0.0  ;;  %v1177_v29 = vadd.f32 %v2062_v13, %v1138_v56  ;;  %v1137_v58 = vadd.f32 %v1010_v22, %v652_v25  ;;  %v667_v30 = vadd.f32 %v1610_v26, %v2035_v62 }
 0x108   : > { %v661_v31 = vpop.f32.mrf.mxu1  ;;  %v1020_v32 = vpop.f32.mrf.mxu0 }
 0x109   : > { %1239 = vst.msk [vmem:[%s2069_s8 + $0x30] sm:$0xff] %vm1232_vm2, %v1206_v28  ;;  %v1209_v33 = vmax.f32 %v1177_v29, 0.0  ;;  %v1176_v34 = vadd.f32 %v2062_v13, %v1137_v58  ;;  %v1140_v60 = vadd.f32 %v1662_v27, %v667_v30  ;;  %v662_v35 = vadd.f32 %v661_v31, %v2039_v0 }
 0x10a   : > { %v1613_v36 = vpop.f32.mrf.mxu1  ;;  %v1665_v37 = vpop.f32.mrf.mxu0 }
 0x10b   : > { %1242 = vst.msk [vmem:[%s2069_s8 + $0x48] sm:$0xff] %vm1232_vm2, %v1209_v33  ;;  %v1208_v38 = vmax.f32 %v1176_v34, 0.0  ;;  %v1179_v39 = vadd.f32 %v2062_v13, %v1140_v60  ;;  %v1139_v62 = vadd.f32 %v1020_v32, %v662_v35  ;;  %v677_v40 = vadd.f32 %v1613_v36, %v2043_v2 }
 0x10c   : > { %v671_v41 = vpop.f32.mrf.mxu1  ;;  %v1030_v42 = vpop.f32.mrf.mxu0 }
 0x10d   : > { %1241 = vst.msk [vmem:[%s2069_s8 + $0x40] sm:$0xff] %vm1232_vm2, %v1208_v38  ;;  %v1211_v44 = vmax.f32 %v1179_v39, 0.0  ;;  %v1178_v46 = vadd.f32 %v2062_v13, %v1139_v62  ;;  %v1142_v0 = vadd.f32 %v1665_v37, %v677_v40  ;;  %v672_v48 = vadd.f32 %v671_v41, %v2047_v4 }
 0x10e   : > { %v1616_v50 = vpop.f32.mrf.mxu1  ;;  %v1668_v10 = vpop.f32.mrf.mxu0 }
 0x10f   : > { %1244 = vst.msk [vmem:[%s2069_s8 + $0x58] sm:$0xff] %vm1232_vm2, %v1211_v44  ;;  %v1210_v11 = vmax.f32 %v1178_v46, 0.0  ;;  %v1181_v12 = vadd.f32 %v2062_v13, %v1142_v0  ;;  %v1141_v2 = vadd.f32 %v1030_v42, %v672_v48  ;;  %v687_v14 = vadd.f32 %v1616_v50, %v2051_v6 }
 0x110   : > { %v681_v15 = vpop.f32.mrf.mxu1  ;;  %v1040_v52 = vpop.f32.mrf.mxu0 }
 0x111   : > { %1243 = vst.msk [vmem:[%s2069_s8 + $0x50] sm:$0xff] %vm1232_vm2, %v1210_v11  ;;  %v1213_v16 = vmax.f32 %v1181_v12, 0.0  ;;  %v1180_v17 = vadd.f32 %v2062_v13, %v1141_v2  ;;  %v1144_v4 = vadd.f32 %v1668_v10, %v687_v14  ;;  %v682_v18 = vadd.f32 %v681_v15, %v2055_v8 }
 0x112   : > { %v1619_v19 = vpop.f32.mrf.mxu1  ;;  %v1671_v54 = vpop.f32.mrf.mxu0 }
 0x113   : > { %1246 = vst.msk [vmem:[%s2069_s8 + $0x68] sm:$0xff] %vm1232_vm2, %v1213_v16  ;;  %v1212_v20 = vmax.f32 %v1180_v17, 0.0  ;;  %v1183_v21 = vadd.f32 %v2062_v13, %v1144_v4  ;;  %v1143_v6 = vadd.f32 %v1040_v52, %v682_v18  ;;  %v697_v22 = vadd.f32 %v1619_v19, %v2009_v43 }
 0x114   : > { %v691_v23 = vpop.f32.mrf.mxu1  ;;  %v1050_v24 = vpop.f32.mrf.mxu0 }
 0x115   : > { %1245 = vst.msk [vmem:[%s2069_s8 + $0x60] sm:$0xff] %vm1232_vm2, %v1212_v20  ;;  %v1215_v56 = vmax.f32 %v1183_v21, 0.0  ;;  %v1182_v25 = vadd.f32 %v2062_v13, %v1143_v6  ;;  %v1146_v8 = vadd.f32 %v1671_v54, %v697_v22  ;;  %v692_v26 = vadd.f32 %v691_v23, %v2011_v45 }
 0x116   : > { %v1622_v27 = vpop.f32.mrf.mxu1  ;;  %v1674_v28 = vpop.f32.mrf.mxu0 }
 0x117   : > { %1248 = vst.msk [vmem:[%s2069_s8 + $0x78] sm:$0xff] %vm1232_vm2, %v1215_v56  ;;  %v1214_v29 = vmax.f32 %v1182_v25, 0.0  ;;  %v1185_v58 = vadd.f32 %v2062_v13, %v1146_v8  ;;  %v1145_v43 = vadd.f32 %v1050_v24, %v692_v26  ;;  %v707_v30 = vadd.f32 %v1622_v27, %v2013_v47 }
 0x118   : > { %v701_v31 = vpop.f32.mrf.mxu1  ;;  %v1060_v32 = vpop.f32.mrf.mxu0 }
 0x119   : > { %1247 = vst.msk [vmem:[%s2069_s8 + $0x70] sm:$0xff] %vm1232_vm2, %v1214_v29  ;;  %v1217_v33 = vmax.f32 %v1185_v58, 0.0  ;;  %v1184_v34 = vadd.f32 %v2062_v13, %v1145_v43  ;;  %v1148_v45 = vadd.f32 %v1674_v28, %v707_v30  ;;  %v702_v60 = vadd.f32 %v701_v31, %v2015_v49 }
 0x11a   : > { %v1625_v35 = vpop.f32.mrf.mxu1  ;;  %v1677_v36 = vpop.f32.mrf.mxu0 }
 0x11b   : > { %1250 = vst.msk [vmem:[%s2069_s8 + $0x88] sm:$0xff] %vm1232_vm2, %v1217_v33  ;;  %v1216_v37 = vmax.f32 %v1184_v34, 0.0  ;;  %v1187_v38 = vadd.f32 %v2062_v13, %v1148_v45  ;;  %v1147_v47 = vadd.f32 %v1060_v32, %v702_v60  ;;  %v717_v39 = vadd.f32 %v1625_v35, %v2017_v51 }
 0x11c   : > { %v711_v62 = vpop.f32.mrf.mxu1  ;;  %v1070_v40 = vpop.f32.mrf.mxu0 }
 0x11d   : > { %1249 = vst.msk [vmem:[%s2069_s8 + $0x80] sm:$0xff] %vm1232_vm2, %v1216_v37  ;;  %v1219_v41 = vmax.f32 %v1187_v38, 0.0  ;;  %v1186_v42 = vadd.f32 %v2062_v13, %v1147_v47  ;;  %v1150_v49 = vadd.f32 %v1677_v36, %v717_v39  ;;  %v712_v44 = vadd.f32 %v711_v62, %v2019_v53 }
 0x11e   : > { %v1628_v46 = vpop.f32.mrf.mxu1  ;;  %v1680_v0 = vpop.f32.mrf.mxu0 }
 0x11f   : > { %1252 = vst.msk [vmem:[%s2069_s8 + $0x98] sm:$0xff] %vm1232_vm2, %v1219_v41  ;;  %v1218_v48 = vmax.f32 %v1186_v42, 0.0  ;;  %v1189_v50 = vadd.f32 %v2062_v13, %v1150_v49  ;;  %v1149_v51 = vadd.f32 %v1070_v40, %v712_v44  ;;  %v727_v10 = vadd.f32 %v1628_v46, %v2021_v55 }
 0x120   : > { %v721_v11 = vpop.f32.mrf.mxu1  ;;  %v1080_v12 = vpop.f32.mrf.mxu0 }
 0x121   : > { %1251 = vst.msk [vmem:[%s2069_s8 + $0x90] sm:$0xff] %vm1232_vm2, %v1218_v48  ;;  %v1221_v2 = vmax.f32 %v1189_v50, 0.0  ;;  %v1188_v14 = vadd.f32 %v2062_v13, %v1149_v51  ;;  %v1152_v53 = vadd.f32 %v1680_v0, %v727_v10  ;;  %v722_v15 = vadd.f32 %v721_v11, %v2025_v57 }
 0x122   : > { %v1631_v52 = vpop.f32.mrf.mxu1  ;;  %v1683_v16 = vpop.f32.mrf.mxu0 }
 0x123   : > { %1254 = vst.msk [vmem:[%s2069_s8 + $0xa8] sm:$0xff] %vm1232_vm2, %v1221_v2  ;;  %v1220_v17 = vmax.f32 %v1188_v14, 0.0  ;;  %v1191_v4 = vadd.f32 %v2062_v13, %v1152_v53  ;;  %v1151_v55 = vadd.f32 %v1080_v12, %v722_v15  ;;  %v737_v18 = vadd.f32 %v1631_v52, %v2029_v59 }
 0x124   : > { %v731_v19 = vpop.f32.mrf.mxu1  ;;  %v1090_v54 = vpop.f32.mrf.mxu0 }
 0x125   : > { %1253 = vst.msk [vmem:[%s2069_s8 + $0xa0] sm:$0xff] %vm1232_vm2, %v1220_v17  ;;  %v1223_v20 = vmax.f32 %v1191_v4, 0.0  ;;  %v1190_v21 = vadd.f32 %v2062_v13, %v1151_v55  ;;  %v1154_v57 = vadd.f32 %v1683_v16, %v737_v18  ;;  %v732_v6 = vadd.f32 %v731_v19, %v2033_v61 }
 0x126   : > { %v1634_v22 = vpop.f32.mrf.mxu1  ;;  %v1686_v23 = vpop.f32.mrf.mxu0 }
 0x127   : > { %1256 = vst.msk [vmem:[%s2069_s8 + $0xb8] sm:$0xff] %vm1232_vm2, %v1223_v20  ;;  %v1222_v24 = vmax.f32 %v1190_v21, 0.0  ;;  %v1193_v56 = vadd.f32 %v2062_v13, %v1154_v57  ;;  %v1153_v59 = vadd.f32 %v1090_v54, %v732_v6  ;;  %v747_v25 = vadd.f32 %v1634_v22, %v2037_v63 }
 0x128   : > { %v741_v8 = vpop.f32.mrf.mxu1  ;;  %v1100_v26 = vpop.f32.mrf.mxu0 }
 0x129   : > { %1255 = vst.msk [vmem:[%s2069_s8 + $0xb0] sm:$0xff] %vm1232_vm2, %v1222_v24  ;;  %v1225_v27 = vmax.f32 %v1193_v56, 0.0  ;;  %v1192_v28 = vadd.f32 %v2062_v13, %v1153_v59  ;;  %v1156_v61 = vadd.f32 %v1686_v23, %v747_v25  ;;  %v742_v29 = vadd.f32 %v741_v8, %v2041_v1 }
 0x12a   : > { %v1637_v58 = vpop.f32.mrf.mxu1  ;;  %v1689_v43 = vpop.f32.mrf.mxu0 }
 0x12b   : > { %1258 = vst.msk [vmem:[%s2069_s8 + $0xc8] sm:$0xff] %vm1232_vm2, %v1225_v27  ;;  %v1224_v30 = vmax.f32 %v1192_v28, 0.0  ;;  %v1195_v31 = vadd.f32 %v2062_v13, %v1156_v61  ;;  %v1155_v63 = vadd.f32 %v1100_v26, %v742_v29  ;;  %v757_v32 = vadd.f32 %v1637_v58, %v2045_v3 }
 0x12c   : > { %v751_v33 = vpop.f32.mrf.mxu1  ;;  %v1110_v34 = vpop.f32.mrf.mxu0 }
 0x12d   : > { %1257 = vst.msk [vmem:[%s2069_s8 + $0xc0] sm:$0xff] %vm1232_vm2, %v1224_v30  ;;  %v1227_v45 = vmax.f32 %v1195_v31, 0.0  ;;  %v1194_v60 = vadd.f32 %v2062_v13, %v1155_v63  ;;  %v1158_v1 = vadd.f32 %v1689_v43, %v757_v32  ;;  %v752_v35 = vadd.f32 %v751_v33, %v2049_v5 }
 0x12e   : > { %v1640_v36 = vpop.f32.mrf.mxu1  ;;  %v1692_v37 = vpop.f32.mrf.mxu0 }
 0x12f   : > { %1260 = vst.msk [vmem:[%s2069_s8 + $0xd8] sm:$0xff] %vm1232_vm2, %v1227_v45  ;;  %v1226_v38 = vmax.f32 %v1194_v60, 0.0  ;;  %v1197_v3 = vadd.f32 %v2062_v13, %v1158_v1  ;;  %v1157_v47 = vadd.f32 %v1110_v34, %v752_v35  ;;  %v767_v39 = vadd.f32 %v1640_v36, %v2053_v7 }
 0x130   : > { %v761_v62 = vpop.f32.mrf.mxu1  ;;  %v1120_v49 = vpop.f32.mrf.mxu0 }
 0x131   : > { %1259 = vst.msk [vmem:[%s2069_s8 + $0xd0] sm:$0xff] %vm1232_vm2, %v1226_v38  ;;  %v1229_v40 = vmax.f32 %v1197_v3, 0.0  ;;  %v1196_v41 = vadd.f32 %v2062_v13, %v1157_v47  ;;  %v1160_v5 = vadd.f32 %v1692_v37, %v767_v39  ;;  %v762_v42 = vadd.f32 %v761_v62, %v2057_v9 }
 0x133   : > { %1262 = vst.msk [vmem:[%s2069_s8 + $0xe8] sm:$0xff] %vm1232_vm2, %v1229_v40  ;;  %v1228_v44 = vmax.f32 %v1196_v41, 0.0  ;;  %v1199_v46 = vadd.f32 %v2062_v13, %v1160_v5  ;;  %v1159_v0 = vadd.f32 %v1120_v49, %v762_v42 }
 0x135   : > { %1261 = vst.msk [vmem:[%s2069_s8 + $0xe0] sm:$0xff] %vm1232_vm2, %v1228_v44  ;;  %v1231_v7 = vmax.f32 %v1199_v46, 0.0  ;;  %v1198_v48 = vadd.f32 %v2062_v13, %v1159_v0 }
 0x137   : > { %1264 = vst.msk [vmem:[%s2069_s8 + $0xf8] sm:$0xff] %vm1232_vm2, %v1231_v7  ;;  %v1230_v50 = vmax.f32 %v1198_v48, 0.0 }
 0x139   : > { %1263 = vst.msk [vmem:[%s2069_s8 + $0xf0] sm:$0xff] %vm1232_vm2, %v1230_v50 }
 0x13a PF: > { %s13_s12 = sadd.s32 1, %s1712_s12  }
 0x13b   : > { %p10_p4 = scmp.ge.s32.totalorder %s13_s12, 4  }
 0x13d   :  { %12 = sbr.rel (!%p10_p4) target bundleno = 1 (0x1), region = 64 }

</bundles_post_ra>
